<compile_context>
chip_gen: v5e
topology: v5e:2x2
jax: 0.10.0
libtpu: 0.0.40
codegen_flags: <defaults>
</compile_context>

<pallas_src>
import functools
import math

import jax
import jax.numpy as jnp
from jax.experimental import pallas as pl
from jax.experimental.pallas import tpu as pltpu


def _round_up(x, m):
    return ((x + m - 1) // m) * m


# ---------------------------------------------------------------------------
# Kernel
# ---------------------------------------------------------------------------
def _gat_kernel(h_ref, w_ref, mask_ref, o_ref, *scratch, alpha, f_out, n_q_tiles):
    """One (batch-block, query-tile) grid step.

    h_ref    : (BB, N, F_in)   VMEM, matmul dtype (f32 or bf16)
    w_ref    : (F_in, F_tot)   VMEM, matmul dtype.  cols [0:F_out] = W,
               col F_out = W@a1, col F_out+1 = W@a2, remaining cols zero pad.
    mask_ref : (TQ, N)         VMEM, bf16 0/1 adjacency mask (query-row tile).
    o_ref    : (BB, TQ, F_tot) VMEM, f32 (lane-dense: F_tot % 128 == 0).
    scratch  : optional (BB, N, F_tot) f32 VMEM buffer caching hW across the
               query-tile grid axis (allocated only when n_q_tiles > 1).
    """
    BB, N, F_in = h_ref.shape
    F_tot = w_ref.shape[1]
    TQ = o_ref.shape[1]

    def compute_hw():
        # Single big MXU matmul: (BB*N, F_in) @ (F_in, F_tot), f32 accumulate.
        h2d = h_ref[...].reshape(BB * N, F_in)
        hw = jnp.dot(h2d, w_ref[...], preferred_element_type=jnp.float32)
        return hw.reshape(BB, N, F_tot)

    if n_q_tiles == 1:
        hW = compute_hw()
        hW_q = hW
    else:
        hw_scratch = scratch[0]
        q = pl.program_id(1)

        @pl.when(q == 0)
        def _():
            hw_scratch[...] = compute_hw()

        hW = hw_scratch[...]                                   # all keys
        q0 = pl.multiple_of(q * TQ, TQ)
        hW_q = hw_scratch[:, pl.ds(q0, TQ), :]                 # this query tile

    # Attention logits.  The a1/a2 projections were folded into W_ext, so f1/f2
    # are just two extra columns of the matmul output.
    f1 = hW_q[:, :, f_out:f_out + 1]                           # (BB, TQ, 1) queries
    f2 = hW[:, :, f_out + 1:f_out + 2]                         # (BB, N, 1)  keys
    e = f1 + jnp.swapaxes(f2, 1, 2)                            # (BB, TQ, N)
    e = jnp.where(e > 0, e, alpha * e)                         # LeakyReLU(alpha)

    # Softmax over the key axis (dim=2 in the torch code); denominator on EUP.
    m = jnp.max(e, axis=-1, keepdims=True)
    p = jnp.exp(e - m)
    inv = pl.reciprocal(jnp.sum(p, axis=-1, keepdims=True), approx=True)
    probs = p * inv

    # TODO(synk): torch.dropout on the attention matrix is skipped (eval mode /
    # dropout_prob = 0.0); no stochastic PRNG path implemented here.

    # Post-softmax adjacency masking, exactly matching the reference:
    # where(adj > 0, probs, -9e15).  Mask travels as bf16 0/1; upcast before
    # the compare so the select stays in f32 vreg layout.
    mask = mask_ref[...].astype(jnp.float32)                   # (TQ, N)
    attention = jnp.where(mask[None, :, :] > 0.0, probs, jnp.float32(-9.0e15))

    if N <= 32:
        # Degenerate MXU shape ((TQ,N)x(N,F) with tiny N): weighted sum of the
        # value rows on the VPU instead (broadcast-multiply + accumulate).
        out = attention[:, :, 0:1] * hW[:, 0:1, :]
        for k in range(1, N):
            out = out + attention[:, :, k:k + 1] * hW[:, k:k + 1, :]
    else:
        # MXU path.  In bf16 mode both operands are cast; -9e15 is exactly the
        # kind of magnitude bf16 represents fine (same exponent range as f32).
        dt = h_ref.dtype
        out = jnp.einsum("bqk,bko->bqo", attention.astype(dt), hW.astype(dt),
                         preferred_element_type=jnp.float32)

    o_ref[...] = jax.nn.sigmoid(out).astype(o_ref.dtype)


# ---------------------------------------------------------------------------
# Generation-aware sizing helpers
# ---------------------------------------------------------------------------
def _vmem_capacity_bytes():
    """Per-core VMEM capacity; conservative v7x value (64 MiB) if query fails."""
    try:
        return int(pltpu.get_tpu_info().vmem_capacity_bytes)
    except Exception:
        return 64 * 1024 * 1024


def _two_tensorcores_per_chip():
    """v7x has 2 TensorCores per chip; v5e/v6e have 1."""
    try:
        kind = jax.devices()[0].device_kind.lower()
    except Exception:
        return False
    return ("v7" in kind) or ("tpu7" in kind) or ("7x" in kind)


def _vmem_need_bytes(BB, N, TQ, F_in, F_tot, mm_bytes, n_q_tiles):
    """Blocks (double-buffered) + scratch + in-kernel temporaries, 2x headroom."""
    f32 = 4
    blocks = 2 * (BB * N * F_in * mm_bytes + BB * TQ * F_tot * f32)    # h, out
    blocks += 2 * (F_in * F_tot * mm_bytes + TQ * N * 2)               # W_ext, bf16 mask
    scratch = BB * N * F_tot * f32 if n_q_tiles > 1 else 0
    temps = BB * N * F_tot * f32                                       # hW value
    temps += 4 * BB * TQ * N * f32                                     # e/p/probs/attention
    if N <= 32:
        temps += BB * TQ * F_tot * f32                                 # VPU accumulation
    return 2 * (blocks + scratch + temps)


def _pick_query_tile(N):
    # Row-tile the (TQ, N) temporaries so large graphs fit v7x's 64 MiB VMEM.
    if N <= 512:
        return N
    for tq in (256, 128):
        if N % tq == 0:
            return tq
    # TODO(synk): pad the query axis for large N not divisible by 128.
    return N


def _pick_batch_block(B, N, TQ, F_in, F_tot, mm_bytes, n_q_tiles, budget, two_tc):
    # Single-TC chips (v5e/v6e): fill VMEM, grid may be a single step.
    # v7x (2 TCs): keep >= 2 batch steps so both cores get work.
    bb = max(1, (B + 1) // 2) if (two_tc and B >= 2) else B
    while bb > 1 and _vmem_need_bytes(bb, N, TQ, F_in, F_tot, mm_bytes, n_q_tiles) > budget:
        bb = (bb + 1) // 2
    return bb


# ---------------------------------------------------------------------------
# pallas_call builder + wrapper
# ---------------------------------------------------------------------------
def _build_gat_call(B_pad, BB, N, TQ, F_in, F_tot, f_out, alpha, n_q_tiles, vmem_limit):
    kernel = functools.partial(_gat_kernel, alpha=alpha, f_out=f_out,
                               n_q_tiles=n_q_tiles)
    scratch_shapes = []
    if n_q_tiles > 1:
        scratch_shapes.append(pltpu.VMEM((BB, N, F_tot), jnp.float32))

    return pl.pallas_call(
        kernel,
        out_shape=jax.ShapeDtypeStruct((B_pad, N, F_tot), jnp.float32),
        grid_spec=pltpu.PrefetchScalarGridSpec(
            num_scalar_prefetch=0,
            grid=(B_pad // BB, n_q_tiles),
            in_specs=[
                pl.BlockSpec((BB, N, F_in), lambda b, q: (b, 0, 0)),   # h
                pl.BlockSpec((F_in, F_tot), lambda b, q: (0, 0)),      # W_ext (invariant)
                pl.BlockSpec((TQ, N), lambda b, q: (q, 0)),            # adjacency mask
            ],
            out_specs=pl.BlockSpec((BB, TQ, F_tot), lambda b, q: (b, q, 0)),
            scratch_shapes=scratch_shapes,
        ),
        compiler_params=pltpu.CompilerParams(
            dimension_semantics=("parallel", "arbitrary"),
            vmem_limit_bytes=vmem_limit,
        ),
    )


def graph_attention_layer(h, adj, W, a, *, alpha, matmul_dtype=jnp.bfloat16,
                          dropout_prob=0.0, is_training=False, batch_block=None):
    """GraphAttentionLayer.forward.

    h: (B, N, F_in) f32, adj: (N, N), W: (F_in, F_out) f32, a: (2*F_out, 1) f32.
    matmul_dtype: dtype of the MXU matmul operands.  bf16 (default) is the
    v6e/v7x fast path; use jnp.float32 for bit-exact parity with the f32
    PyTorch module (the -9e15 sentinel path makes rare saturated 0/1 outputs
    sign-sensitive to hW rounding).
    """
    if is_training and dropout_prob > 0.0:
        # TODO(synk): attention dropout not implemented in the kernel.
        raise NotImplementedError("attention dropout not supported; use eval mode")

    B, N, F_in = h.shape
    F_out = W.shape[1]
    assert a.shape == (2 * F_out, 1)
    mm_dtype = jnp.dtype(matmul_dtype)

    # Lane-dense output width (multiple of 128) with W@a1 / W@a2 folded into
    # two of the padding columns -> f1/f2 come out of the single h@W matmul.
    F_tot = _round_up(F_out + 2, 128)
    W_ext = jnp.zeros((F_in, F_tot), jnp.float32)
    W_ext = W_ext.at[:, :F_out].set(W.astype(jnp.float32))
    W_ext = W_ext.at[:, F_out:F_out + 1].set(W @ a[:F_out, :])
    W_ext = W_ext.at[:, F_out + 1:F_out + 2].set(W @ a[F_out:, :])
    W_ext = W_ext.astype(mm_dtype)
    h_mm = h.astype(mm_dtype)

    # Adjacency as a bf16 0/1 mask (half the HBM / VMEM of an f32 bias).
    mask = (adj > 0).astype(jnp.bfloat16)

    TQ = _pick_query_tile(N)
    n_q = max(1, N // TQ)
    vmem_cap = _vmem_capacity_bytes()
    budget = max(vmem_cap - 16 * 1024 * 1024, 32 * 1024 * 1024)
    two_tc = _two_tensorcores_per_chip()

    if batch_block is None:
        BB = _pick_batch_block(B, N, TQ, F_in, F_tot, mm_dtype.itemsize, n_q,
                               budget, two_tc)
    else:
        BB = max(1, min(batch_block, B))
    n_b = -(-B // BB)
    B_pad = n_b * BB
    if B_pad != B:
        h_mm = jnp.pad(h_mm, ((0, B_pad - B), (0, 0), (0, 0)))

    vmem_limit = int(min(
        max(_vmem_need_bytes(BB, N, TQ, F_in, F_tot, mm_dtype.itemsize, n_q),
            32 * 1024 * 1024),
        budget))

    out = _build_gat_call(B_pad, BB, N, TQ, F_in, F_tot, F_out, alpha, n_q,
                          vmem_limit)(h_mm, W_ext, mask)
    return out[:B, :, :F_out]


# ---------------------------------------------------------------------------
# Pure-JAX reference (same math as the PyTorch forward, eval mode)
# ---------------------------------------------------------------------------
def _reference(h, adj, W, a, alpha, matmul_dtype=jnp.float32):
    F_out = W.shape[1]
    dt = jnp.dtype(matmul_dtype)
    if dt == jnp.float32:
        hW = h @ W
    else:
        hW = jnp.dot(h.astype(dt), W.astype(dt), preferred_element_type=jnp.float32)
    e = hW @ a[:F_out, :] + jnp.swapaxes(hW @ a[F_out:, :], 1, 2)
    e = jnp.where(e > 0, e, alpha * e)
    e = jax.nn.softmax(e, axis=2)
    att = jnp.where(adj > 0, e, -9.0e15)
    return jax.nn.sigmoid(att @ hW)


def _xavier_uniform(key, shape, gain):
    fan_in, fan_out = shape[0], shape[1]
    limit = gain * math.sqrt(6.0 / (fan_in + fan_out))
    return jax.random.uniform(key, shape, jnp.float32, -limit, limit)


if __name__ == "__main__":
    B, N, F_IN, F_OUT = 4, 8, 16, 32
    ALPHA = 0.2  # LeakyReLU negative slope

    key = jax.random.PRNGKey(0)
    k_h, k_adj, k_w, k_a = jax.random.split(key, 4)

    # Deterministic parameter init (xavier_uniform, gain=1.414 as in __init__).
    W = _xavier_uniform(k_w, (F_IN, F_OUT), gain=1.414)
    a = _xavier_uniform(k_a, (2 * F_OUT, 1), gain=1.414)

    # Node features and a binary adjacency matrix with self-loops.
    h = jax.random.normal(k_h, (B, N, F_IN), jnp.float32)
    adj = (jax.random.uniform(k_adj, (N, N)) > 0.5).astype(jnp.float32)
    adj = jnp.maximum(adj, jnp.eye(N, dtype=jnp.float32))

    # 1) Exact f32 path: matches the f32 PyTorch forward (eval mode) up to MXU
    #    accumulation order and the approximate (EUP) softmax reciprocal.
    out_f32 = jax.block_until_ready(
        graph_attention_layer(h, adj, W, a, alpha=ALPHA, matmul_dtype=jnp.float32))
    ref_f32 = _reference(h, adj, W, a, ALPHA, jnp.float32)
    assert out_f32.shape == (B, N, F_OUT)
    err_f32 = float(jnp.max(jnp.abs(out_f32 - ref_f32)))
    assert jnp.allclose(out_f32, ref_f32, atol=5e-3, rtol=5e-3), err_f32

    # 2) Default bf16-MXU fast path, checked against a reference applying the
    #    same matmul-operand dtype policy.
    out_bf16 = jax.block_until_ready(
        graph_attention_layer(h, adj, W, a, alpha=ALPHA))
    ref_bf16 = _reference(h, adj, W, a, ALPHA, jnp.bfloat16)
    assert out_bf16.shape == (B, N, F_OUT)
    err_bf16 = float(jnp.max(jnp.abs(out_bf16 - ref_bf16)))
    assert jnp.allclose(out_bf16, ref_bf16, atol=5e-2, rtol=5e-2), err_bf16

    print("KERNEL_OK")
</pallas_src>

<mosaic_0001>
module attributes {stable_mosaic.version = 11 : i64} {
  func.func @_gat_kernel(%arg0: i32, %arg1: i32, %arg2: memref<4x8x16xf32, #tpu.memory_space<vmem>>, %arg3: memref<16x128xf32, #tpu.memory_space<vmem>>, %arg4: memref<8x8xbf16, #tpu.memory_space<vmem>>, %arg5: memref<4x8x128xf32, #tpu.memory_space<vmem>>) attributes {dimension_semantics = [#tpu.dimension_semantics<parallel>, #tpu.dimension_semantics<arbitrary>], iteration_bounds = array<i64: 1, 1>, scalar_prefetch = 0 : i64, scratch_operands = 0 : i64, tpu.core_type = #tpu.core_type<tc>, window_params = [{transform_indices = @transform_0, window_bounds = array<i64: 4, 8, 16>}, {pipeline_mode = #tpu.pipeline_mode<synchronous>, transform_indices = @transform_1, window_bounds = array<i64: 16, 128>}, {transform_indices = @transform_2, window_bounds = array<i64: 8, 8>}, {transform_indices = @transform_3, window_bounds = array<i64: 4, 8, 128>}]} {
    %c0 = arith.constant 0 : index
    %c0_0 = arith.constant 0 : index
    %c0_1 = arith.constant 0 : index
    %0 = vector.load %arg2[%c0, %c0_0, %c0_1] : memref<4x8x16xf32, #tpu.memory_space<vmem>>, vector<4x8x16xf32>
    %1 = vector.shape_cast %0 : vector<4x8x16xf32> to vector<32x16xf32>
    %c0_2 = arith.constant 0 : index
    %c0_3 = arith.constant 0 : index
    %2 = vector.load %arg3[%c0_2, %c0_3] : memref<16x128xf32, #tpu.memory_space<vmem>>, vector<16x128xf32>
    %cst = arith.constant dense<0.000000e+00> : vector<32x128xf32>
    %3 = tpu.matmul %1, %2, %cst {dimension_numbers = #tpu.dot_dimension_numbers<[1], [0], [0], [1], [0, 0, 1, 1], [], []>} : vector<32x16xf32>, vector<16x128xf32>, vector<32x128xf32> -> vector<32x128xf32>
    %4 = vector.shape_cast %3 : vector<32x128xf32> to vector<4x8x128xf32>
    %5 = vector.extract_strided_slice %4 {offsets = [0, 0, 32], sizes = [4, 8, 1], strides = [1, 1, 1]} : vector<4x8x128xf32> to vector<4x8x1xf32>
    %6 = vector.extract_strided_slice %4 {offsets = [0, 0, 33], sizes = [4, 8, 1], strides = [1, 1, 1]} : vector<4x8x128xf32> to vector<4x8x1xf32>
    %7 = tpu.transpose %6, [0, 2, 1] : vector<4x8x1xf32> -> vector<4x1x8xf32>
    %8 = vector.broadcast %5 : vector<4x8x1xf32> to vector<4x8x8xf32>
    %9 = vector.broadcast %7 : vector<4x1x8xf32> to vector<4x8x8xf32>
    %10 = arith.addf %8, %9 : vector<4x8x8xf32>
    %cst_4 = arith.constant 0.000000e+00 : f32
    %11 = vector.broadcast %cst_4 : f32 to vector<4x8x8xf32>
    %12 = arith.cmpf ogt, %10, %11 : vector<4x8x8xf32>
    %cst_5 = arith.constant 2.000000e-01 : f32
    %13 = vector.broadcast %cst_5 : f32 to vector<4x8x8xf32>
    %14 = arith.mulf %13, %10 : vector<4x8x8xf32>
    %15 = arith.select %12, %10, %14 : vector<4x8x8xi1>, vector<4x8x8xf32>
    %cst_6 = arith.constant dense<0xFF800000> : vector<4x8xf32>
    %16 = vector.multi_reduction <maximumf>, %15, %cst_6 [2] : vector<4x8x8xf32> to vector<4x8xf32>
    %17 = vector.shape_cast %16 : vector<4x8xf32> to vector<4x8x1xf32>
    %18 = vector.broadcast %17 : vector<4x8x1xf32> to vector<4x8x8xf32>
    %19 = arith.subf %15, %18 : vector<4x8x8xf32>
    %20 = math.exp %19 : vector<4x8x8xf32>
    %cst_7 = arith.constant dense<0.000000e+00> : vector<4x8xf32>
    %21 = vector.multi_reduction <add>, %20, %cst_7 [2] : vector<4x8x8xf32> to vector<4x8xf32>
    %22 = vector.shape_cast %21 : vector<4x8xf32> to vector<4x8x1xf32>
    %23 = tpu.reciprocal %22 {approx = true} : vector<4x8x1xf32> -> vector<4x8x1xf32>
    %24 = vector.broadcast %23 : vector<4x8x1xf32> to vector<4x8x8xf32>
    %25 = arith.mulf %20, %24 : vector<4x8x8xf32>
    %c0_8 = arith.constant 0 : index
    %c0_9 = arith.constant 0 : index
    %26 = vector.load %arg4[%c0_8, %c0_9] : memref<8x8xbf16, #tpu.memory_space<vmem>>, vector<8x8xbf16>
    %27 = arith.extf %26 : vector<8x8xbf16> to vector<8x8xf32>
    %28 = vector.shape_cast %27 : vector<8x8xf32> to vector<1x8x8xf32>
    %cst_10 = arith.constant 0.000000e+00 : f32
    %29 = vector.broadcast %cst_10 : f32 to vector<1x8x8xf32>
    %30 = arith.cmpf ogt, %28, %29 : vector<1x8x8xf32>
    %cst_11 = arith.constant -9.000000e+15 : f32
    %31 = vector.shape_cast %30 : vector<1x8x8xi1> to vector<1x8x8xi1>
    %32 = vector.broadcast %31 : vector<1x8x8xi1> to vector<4x8x8xi1>
    %33 = vector.broadcast %cst_11 : f32 to vector<4x8x8xf32>
    %34 = arith.select %32, %25, %33 : vector<4x8x8xi1>, vector<4x8x8xf32>
    %35 = vector.extract_strided_slice %34 {offsets = [0, 0, 0], sizes = [4, 8, 1], strides = [1, 1, 1]} : vector<4x8x8xf32> to vector<4x8x1xf32>
    %36 = vector.extract_strided_slice %4 {offsets = [0, 0, 0], sizes = [4, 1, 128], strides = [1, 1, 1]} : vector<4x8x128xf32> to vector<4x1x128xf32>
    %37 = vector.broadcast %35 : vector<4x8x1xf32> to vector<4x8x128xf32>
    %38 = vector.broadcast %36 : vector<4x1x128xf32> to vector<4x8x128xf32>
    %39 = arith.mulf %37, %38 : vector<4x8x128xf32>
    %40 = vector.extract_strided_slice %34 {offsets = [0, 0, 1], sizes = [4, 8, 1], strides = [1, 1, 1]} : vector<4x8x8xf32> to vector<4x8x1xf32>
    %41 = vector.extract_strided_slice %4 {offsets = [0, 1, 0], sizes = [4, 1, 128], strides = [1, 1, 1]} : vector<4x8x128xf32> to vector<4x1x128xf32>
    %42 = vector.broadcast %40 : vector<4x8x1xf32> to vector<4x8x128xf32>
    %43 = vector.broadcast %41 : vector<4x1x128xf32> to vector<4x8x128xf32>
    %44 = arith.mulf %42, %43 : vector<4x8x128xf32>
    %45 = arith.addf %39, %44 : vector<4x8x128xf32>
    %46 = vector.extract_strided_slice %34 {offsets = [0, 0, 2], sizes = [4, 8, 1], strides = [1, 1, 1]} : vector<4x8x8xf32> to vector<4x8x1xf32>
    %47 = vector.extract_strided_slice %4 {offsets = [0, 2, 0], sizes = [4, 1, 128], strides = [1, 1, 1]} : vector<4x8x128xf32> to vector<4x1x128xf32>
    %48 = vector.broadcast %46 : vector<4x8x1xf32> to vector<4x8x128xf32>
    %49 = vector.broadcast %47 : vector<4x1x128xf32> to vector<4x8x128xf32>
    %50 = arith.mulf %48, %49 : vector<4x8x128xf32>
    %51 = arith.addf %45, %50 : vector<4x8x128xf32>
    %52 = vector.extract_strided_slice %34 {offsets = [0, 0, 3], sizes = [4, 8, 1], strides = [1, 1, 1]} : vector<4x8x8xf32> to vector<4x8x1xf32>
    %53 = vector.extract_strided_slice %4 {offsets = [0, 3, 0], sizes = [4, 1, 128], strides = [1, 1, 1]} : vector<4x8x128xf32> to vector<4x1x128xf32>
    %54 = vector.broadcast %52 : vector<4x8x1xf32> to vector<4x8x128xf32>
    %55 = vector.broadcast %53 : vector<4x1x128xf32> to vector<4x8x128xf32>
    %56 = arith.mulf %54, %55 : vector<4x8x128xf32>
    %57 = arith.addf %51, %56 : vector<4x8x128xf32>
    %58 = vector.extract_strided_slice %34 {offsets = [0, 0, 4], sizes = [4, 8, 1], strides = [1, 1, 1]} : vector<4x8x8xf32> to vector<4x8x1xf32>
    %59 = vector.extract_strided_slice %4 {offsets = [0, 4, 0], sizes = [4, 1, 128], strides = [1, 1, 1]} : vector<4x8x128xf32> to vector<4x1x128xf32>
    %60 = vector.broadcast %58 : vector<4x8x1xf32> to vector<4x8x128xf32>
    %61 = vector.broadcast %59 : vector<4x1x128xf32> to vector<4x8x128xf32>
    %62 = arith.mulf %60, %61 : vector<4x8x128xf32>
    %63 = arith.addf %57, %62 : vector<4x8x128xf32>
    %64 = vector.extract_strided_slice %34 {offsets = [0, 0, 5], sizes = [4, 8, 1], strides = [1, 1, 1]} : vector<4x8x8xf32> to vector<4x8x1xf32>
    %65 = vector.extract_strided_slice %4 {offsets = [0, 5, 0], sizes = [4, 1, 128], strides = [1, 1, 1]} : vector<4x8x128xf32> to vector<4x1x128xf32>
    %66 = vector.broadcast %64 : vector<4x8x1xf32> to vector<4x8x128xf32>
    %67 = vector.broadcast %65 : vector<4x1x128xf32> to vector<4x8x128xf32>
    %68 = arith.mulf %66, %67 : vector<4x8x128xf32>
    %69 = arith.addf %63, %68 : vector<4x8x128xf32>
    %70 = vector.extract_strided_slice %34 {offsets = [0, 0, 6], sizes = [4, 8, 1], strides = [1, 1, 1]} : vector<4x8x8xf32> to vector<4x8x1xf32>
    %71 = vector.extract_strided_slice %4 {offsets = [0, 6, 0], sizes = [4, 1, 128], strides = [1, 1, 1]} : vector<4x8x128xf32> to vector<4x1x128xf32>
    %72 = vector.broadcast %70 : vector<4x8x1xf32> to vector<4x8x128xf32>
    %73 = vector.broadcast %71 : vector<4x1x128xf32> to vector<4x8x128xf32>
    %74 = arith.mulf %72, %73 : vector<4x8x128xf32>
    %75 = arith.addf %69, %74 : vector<4x8x128xf32>
    %76 = vector.extract_strided_slice %34 {offsets = [0, 0, 7], sizes = [4, 8, 1], strides = [1, 1, 1]} : vector<4x8x8xf32> to vector<4x8x1xf32>
    %77 = vector.extract_strided_slice %4 {offsets = [0, 7, 0], sizes = [4, 1, 128], strides = [1, 1, 1]} : vector<4x8x128xf32> to vector<4x1x128xf32>
    %78 = vector.broadcast %76 : vector<4x8x1xf32> to vector<4x8x128xf32>
    %79 = vector.broadcast %77 : vector<4x1x128xf32> to vector<4x8x128xf32>
    %80 = arith.mulf %78, %79 : vector<4x8x128xf32>
    %81 = arith.addf %75, %80 : vector<4x8x128xf32>
    %82 = arith.negf %81 : vector<4x8x128xf32>
    %83 = math.exp %82 : vector<4x8x128xf32>
    %cst_12 = arith.constant 1.000000e+00 : f32
    %84 = vector.broadcast %cst_12 : f32 to vector<4x8x128xf32>
    %85 = arith.addf %84, %83 : vector<4x8x128xf32>
    %86 = arith.divf %84, %85 : vector<4x8x128xf32>
    %c0_13 = arith.constant 0 : index
    %c0_14 = arith.constant 0 : index
    %c0_15 = arith.constant 0 : index
    %87 = vector.load %arg5[%c0_13, %c0_14, %c0_15] : memref<4x8x128xf32, #tpu.memory_space<vmem>>, vector<4x8x128xf32>
    tpu.vector_store %arg5[%c0_13, %c0_14, %c0_15], %86 {strides = array<i32>} : memref<4x8x128xf32, #tpu.memory_space<vmem>>, vector<4x8x128xf32>,
    return
  }
  func.func @transform_0(%arg0: i32, %arg1: i32) -> (i32, i32, i32) {
    %c0_i32 = arith.constant 0 : i32
    %c0_i32_0 = arith.constant 0 : i32
    %c0_i32_1 = arith.constant 0 : i32
    return %arg0, %c0_i32, %c0_i32_0 : i32, i32, i32
  }
  func.func @transform_1(%arg0: i32, %arg1: i32) -> (i32, i32) {
    %c0_i32 = arith.constant 0 : i32
    %c0_i32_0 = arith.constant 0 : i32
    %c0_i32_1 = arith.constant 0 : i32
    return %c0_i32, %c0_i32_0 : i32, i32
  }
  func.func @transform_2(%arg0: i32, %arg1: i32) -> (i32, i32) {
    %c0_i32 = arith.constant 0 : i32
    %c0_i32_0 = arith.constant 0 : i32
    return %arg1, %c0_i32 : i32, i32
  }
  func.func @transform_3(%arg0: i32, %arg1: i32) -> (i32, i32, i32) {
    %c0_i32 = arith.constant 0 : i32
    %c0_i32_0 = arith.constant 0 : i32
    return %arg0, %arg1, %c0_i32 : i32, i32, i32
  }
}

</mosaic_0001>

<bundles_post_ra>
// kernel: tpu_custom_call.1
= control target key start
LH: loop header
LB: loop body
LE: loop exit
PB: predicated region body
PF: predicated region fallthrough
CT: control target
= control target key end

     0   :  { %8 = vsyncpa [#allocation3], 0  ;;  %s1016_s0 = inlined_call_operand.hbm [shape: f32[4,8,16], index: 0, kind: input, shape index: {}]   ;;  %s1017_s1 = inlined_call_operand.hbm [shape: f32[16,128], index: 1, kind: input, shape index: {}]   ;;  %s1018_s2 = inlined_call_operand.hbm [shape: bf16[8,8], index: 2, kind: input, shape index: {}]   ;;  %s1019_s3 = inlined_call_operand.hbm [shape: f32[4,8,128], index: 3, kind: output, shape index: {}]  }
   0x1   :  { %9 = vsyncpa [#allocation6], 0 }
   0x2   :  { %10 = vsyncpa [#allocation4], 0  ;;  %s28_s14 = sshll.u32 %s1017_s1, 4  ;;  %s866_s15 = smov [#allocation5]   ;;  %s29_s14 = int_to_ptr.hbm [resolvable:$true] %s28_s14 }
   0x3   :  { %s30_s16 = sshll.u32 %s866_s15, 4  ;;  %s15_s19 = sshll.u32 %s1016_s0, 4  ;;  %s31_s16 = int_to_ptr.vmem [resolvable:$true] %s30_s16  ;;  %s16_s19 = int_to_ptr.hbm [resolvable:$true] %s15_s19 }
   0x4   :  { %s867_s20 = smov 128   ;;  %s868_s21 = smov 8  }
   0x5   :  { %36 = dma.hbm_to_vmem [thread:$0]  %s29_s14, 256, %s31_s16, [#allocation6], %s867_s20, %s867_s20, %s868_s21  }
   0x6   :  { %s869_s22 = smov [#allocation2]   ;;  %s42_s1 = sshll.u32 %s1018_s2, 4  ;;  %s43_s1 = int_to_ptr.hbm [resolvable:$true] %s42_s1 }
   0x7   :  { %s17_s23 = sshll.u32 %s869_s22, 4  ;;  %s870_s0 = smov [#allocation7]   ;;  %s18_s23 = int_to_ptr.vmem [resolvable:$true] %s17_s23 }
   0x8   :  { %23 = dma.hbm_to_vmem [thread:$0]  %s16_s19, 512, %s18_s23, [#allocation3], %s867_s20, %s867_s20, %s868_s21  }
   0x9   :  { %s44_s26 = sshll.u32 %s870_s0, 4  ;;  %s45_s26 = int_to_ptr.vmem [resolvable:$true] %s44_s26 }
   0xa   :  { %47 = dma.hbm_to_vmem [thread:$0]  %s43_s1, 64, %s45_s26, [#allocation6]  }
   0xb   :  { %860 = dma.done.wait [#allocation3], 512  }
   0xc   :  { %861 = vsyncadd [#allocation3], 4294966784 }
   0xd   :  { %862 = dma.done.wait [#allocation6], 320  }
   0xe   :  { %863 = vsyncadd [#allocation6], 4294966976  ;;  %v871_v0 = vmov 32   ;;  %v65_v1 = vld [vmem:[#allocation5 + $0x8] sm:$0xff]  ;;  %v64_v2 = vld [vmem:[#allocation5] sm:$0xff]  ;;  %vm66_vm0 = vcmask 130048  }
   0xf   :  { %697 = vset.pattern.permute.xlu2 %v871_v0  ;;  %698 = vset.pattern.permute.xlu0 %v871_v0  ;;  %v60_v3 = vld [vmem:[#allocation2] sm:$0xff]  ;;  %v62_v4 = vld [vmem:[#allocation2 + $0x10] sm:$0xff]  ;;  %v61_v5 = vld [vmem:[#allocation2 + $0x8] sm:$0xff]  ;;  %s872_s2 = smov 95   ;;  %vm288_vm2 = vcmask 64512   ;;  %v873_v63 = vmov 1  }
  0x10   :  { %699 = vset.pattern.permute.xlu1 %v871_v0  ;;  %93 = vmatpush.msra.mxu0 %v65_v1  ;;  %v63_v6 = vld [vmem:[#allocation2 + $0x18] sm:$0xff]  ;;  %v874_v0 = vmov 0   ;;  %s881_s27 = smov [#allocation8]   ;;  %s652_s4 = sshll.u32 %s1019_s3, 4  ;;  %s653_s4 = int_to_ptr.hbm [resolvable:$true] %s652_s4 }
  0x11   :  { %675 = vmatpush.msra.mxu2 %v65_v1  ;;  %674 = vmatpush.msra.mxu1 %v65_v1  ;;  %s650_s28 = sshll.u32 %s881_s27, 4  ;;  %s651_s28 = int_to_ptr.vmem [resolvable:$true] %s650_s28 }
  0x12   :  { %676 = vmatpush.msra.mxu3 %v65_v1  ;;  %94 = vmatpush.msra.mxu0 %v64_v2  ;;  %v333_v1 = vld [vmem:[#allocation7] sm:$0xf] }
  0x13   :  { %678 = vmatpush.msra.mxu2 %v64_v2  ;;  %666 = vmatmul.msk.f32.vlgmr.msra.gmra.mxu0 %vm66_vm0, %v60_v3  ;;  %v334_v3 = vunpack.c.l.bf16 %v333_v1 }
  0x14   :  { %668 = vmatmul.msk.f32.vlgmr.msra.gmra.mxu2 %vm66_vm0, %v62_v4  ;;  %677 = vmatpush.msra.mxu1 %v64_v2 }
  0x15   :  { %679 = vmatpush.msra.mxu3 %v64_v2  ;;  %667 = vmatmul.msk.f32.vlgmr.msra.gmra.mxu1 %vm66_vm0, %v61_v5  ;;  %vm944_vm6 = vcmp.gt.f32.partialorder %v334_v3, 0.0 }
  0x16   :  { %669 = vmatmul.msk.f32.vlgmr.msra.gmra.mxu3 %vm66_vm0, %v63_v6 }
  0x90   :  { %v917_v7 = vpop.f32.mrf.mxu0 }
  0x91   :  { %253 = vperm.xlu2 %697, %v917_v7   ;;  %112 = vrot.lane.b32.xlu0 %v917_v7, %s872_s2  ;;  %v470_v3 = vperm.slane %v917_v7, 4 }
  0x92   :  { %v923_v9 = vpop.f32.mrf.mxu1 }
  0x97   :  { %v921_v8 = vpop.f32.mrf.mxu2 }
  0x98   :  { %116 = vrot.lane.b32.xlu1 %v921_v8, %s872_s2 }
  0x99   :  { %v926_v10 = vpop.f32.mrf.mxu3  ;;  %114 = vrot.lane.b32.xlu0 %v923_v9, %s872_s2 }
  0x9a   :  { %265 = vperm.xlu2 %697, %v926_v10  }
  0xa0   :  { %118 = vrot.lane.b32.xlu1 %v926_v10, %s872_s2 }
  0xa1   :  { %257 = vperm.xlu0 %698, %v923_v9  }
  0xa8   :  { %261 = vperm.xlu1 %699, %v921_v8  }
  0xeb   :  { %v254_v15 = vpop.permute.xlu2 %253 }
  0xf4   :  { %v266_v16 = vpop.permute.xlu2 %265 }
 0x103   :  { %v113_v11 = vpop.permute.xlu0 %112 }
 0x104   :  { %124 = vxpose.xlu2.b32.start.end [1/1] (short) (narrow) %v113_v11, 8 }
 0x10a   :  { %v117_v12 = vpop.permute.xlu1 %116 }
 0x10b   :  { %188 = vxpose.xlu0.b32.start.end [1/1] (short) (narrow) %v117_v12, 8  ;;  %v115_v13 = vpop.permute.xlu0 %114 }
 0x10c   :  { %156 = vxpose.xlu2.b32.start.end [1/1] (short) (narrow) %v115_v13, 8 }
 0x112   :  { %v119_v14 = vpop.permute.xlu1 %118 }
 0x113   :  { %220 = vxpose.xlu1.b32.start.end [1/1] (short) (narrow) %v119_v14, 8  ;;  %v258_v24 = vpop.permute.xlu0 %257 }
 0x11a   :  { %v262_v30 = vpop.permute.xlu1 %261 }
 0x166   :  { %702 = vset.pattern.permute.xlu1 %v873_v63 }
 0x16e   :  { %701 = vset.pattern.permute.xlu2 %v874_v0 }
 0x172   :  { %700 = vset.pattern.permute.xlu0 %v874_v0 }
 0x19d   :  { %v140_v17 = vpop.trf.xlu2 }
 0x19e   :  { %v268_v18 = vperm.slane %v140_v17, 0  ;;  %v876_v17 = vmov 4  }
 0x1a0   :  { %v272_v19 = vadd.f32 %v268_v18, %v254_v15 }
 0x1a2   :  { %vm276_vm1 = vcmp.gt.f32.partialorder %v272_v19, 0.0  ;;  %v280_v20 = vmul.f32 0.2, %v272_v19 }
 0x1a4   :  { %v284_v21 = vsel %vm276_vm1, %v272_v19, %v280_v20  ;;  %v877_v19 = vmov 3   ;;  %v878_v20 = vmov 5  }
 0x1a5   :  { %v172_v22 = vpop.trf.xlu2  ;;  %v289_v23 = vsel %vm288_vm2, %v284_v21, -inf }
 0x1a6   :  { %v269_v25 = vperm.slane %v172_v22, 0  ;;  %290 = vmax.xlane.f32.xlu2 %v289_v23 }
 0x1a8   :  { %v273_v26 = vadd.f32 %v269_v25, %v258_v24 }
 0x1aa   :  { %vm277_vm3 = vcmp.gt.f32.partialorder %v273_v26, 0.0  ;;  %v281_v27 = vmul.f32 0.2, %v273_v26 }
 0x1ac   :  { %v285_v28 = vsel %vm277_vm3, %v273_v26, %v281_v27  ;;  %v879_v27 = vmov 6  }
 0x1ad   :  { %v292_v29 = vsel %vm288_vm2, %v285_v28, -inf }
 0x1ae   :  { %293 = vmax.xlane.f32.xlu1 %v292_v29  ;;  %v880_v29 = vmov 7  }
 0x1af   :  { %v204_v31 = vpop.trf.xlu0 }
 0x1b0   :  { %v270_v32 = vperm.slane %v204_v31, 0 }
 0x1b2   :  { %v274_v33 = vadd.f32 %v270_v32, %v262_v30  ;;  %v363_v30 = vperm.slane %v923_v9, 0 }
 0x1b4   :  { %vm278_vm4 = vcmp.gt.f32.partialorder %v274_v33, 0.0  ;;  %v282_v34 = vmul.f32 0.2, %v274_v33 }
 0x1b6   :  { %v286_v35 = vsel %vm278_vm4, %v274_v33, %v282_v34  ;;  %v387_v33 = vperm.slane %v923_v9, 1 }
 0x1b7   :  { %v236_v36 = vpop.trf.xlu1  ;;  %v295_v37 = vsel %vm288_vm2, %v286_v35, -inf }
 0x1b8   :  { %v271_v38 = vperm.slane %v236_v36, 0  ;;  %296 = vmax.xlane.f32.xlu0 %v295_v37 }
 0x1ba   :  { %v275_v39 = vadd.f32 %v271_v38, %v266_v16  ;;  %v875_v16 = vmov 2  }
 0x1bc   :  { %vm279_vm5 = vcmp.gt.f32.partialorder %v275_v39, 0.0  ;;  %v283_v40 = vmul.f32 0.2, %v275_v39 }
 0x1be   :  { %v287_v41 = vsel %vm279_vm5, %v275_v39, %v283_v40  ;;  %v415_v40 = vperm.slane %v923_v9, 2 }
 0x1bf   :  { %v298_v42 = vsel %vm288_vm2, %v287_v41, -inf }
 0x1c0   :  { %299 = vmax.xlane.f32.xlu2 %v298_v42 }
 0x219   :  { %v291_v43 = vpop.xlane.xlu2 %290 }
 0x21a   :  { %v301_v44 = vsub.f32 %v284_v21, %v291_v43 }
 0x21c   :  { %v305_v45 = vmul.f32 1.442695, %v301_v44  ;;  %v443_v44 = vperm.slane %v923_v9, 3 }
 0x21e   :  { %732 = vpow2.f32 %v305_v45 }
 0x221   :  { %v294_v46 = vpop.xlane.xlu1 %293 }
 0x222   :  { %v302_v47 = vsub.f32 %v285_v28, %v294_v46 }
 0x224   :  { %v733_v48 = vpop.eup %732  ;;  %v307_v49 = vmul.f32 1.442695, %v302_v47 }
 0x225   :  { %v313_v50 = vsel %vm288_vm2, %v733_v48, 0.0 }
 0x226   :  { %734 = vpow2.f32 %v307_v49  ;;  %314 = vadd.xlane.f32.xlu2 %v313_v50  ;;  %v386_v49 = vperm.slane %v917_v7, 1  ;;  %v362_v50 = vperm.slane %v917_v7, 0 }
 0x22b   :  { %v297_v51 = vpop.xlane.xlu0 %296 }
 0x22c   :  { %v303_v52 = vsub.f32 %v286_v35, %v297_v51  ;;  %v735_v53 = vpop.eup %734 }
 0x22d   :  { %v316_v55 = vsel %vm288_vm2, %v735_v53, 0.0 }
 0x22e   :  { %v309_v54 = vmul.f32 1.442695, %v303_v52  ;;  %317 = vadd.xlane.f32.xlu2 %v316_v55  ;;  %v414_v55 = vperm.slane %v917_v7, 2 }
 0x230   :  { %736 = vpow2.f32 %v309_v54 }
 0x233   :  { %v300_v56 = vpop.xlane.xlu2 %299 }
 0x234   :  { %v304_v57 = vsub.f32 %v287_v41, %v300_v56 }
 0x236   :  { %v737_v58 = vpop.eup %736  ;;  %v311_v59 = vmul.f32 1.442695, %v304_v57 }
 0x237   :  { %v319_v60 = vsel %vm288_vm2, %v737_v58, 0.0 }
 0x238   :  { %738 = vpow2.f32 %v311_v59  ;;  %320 = vadd.xlane.f32.xlu2 %v319_v60  ;;  %v471_v60 = vperm.slane %v923_v9, 4 }
 0x23e   :  { %v739_v61 = vpop.eup %738 }
 0x23f   :  { %v322_v62 = vsel %vm288_vm2, %v739_v61, 0.0 }
 0x240   :  { %323 = vadd.xlane.f32.xlu1 %v322_v62 }
 0x299   :  { %v315_v2 = vpop.xlane.xlu2 %314 }
 0x29a   :  { %740 = vrcp.f32 %v315_v2  ;;  %v527_v2 = vperm.slane %v923_v9, 6 }
 0x2a0   :  { %v741_v4 = vpop.eup %740 }
 0x2a1   :  { %v329_v6 = vmul.f32 %v741_v4, %v733_v48  ;;  %v318_v11 = vpop.xlane.xlu2 %317 }
 0x2a2   :  { %742 = vrcp.f32 %v318_v11 }
 0x2a3   :  { %v338_v12 = vsel %vm944_vm6, %v329_v6, -9e+15 }
 0x2a4   :  { %371 = vperm.xlu1 %702, %v338_v12   ;;  %344 = vperm.xlu0 %700, %v338_v12  }
 0x2a8   :  { %v743_v13 = vpop.eup %742 }
 0x2a9   :  { %v330_v14 = vmul.f32 %v743_v13, %v735_v53 }
 0x2ab   :  { %v952_v15 = vsel %vm944_vm6, %v330_v14, -9e+15  ;;  %v321_v18 = vpop.xlane.xlu2 %320 }
 0x2ac   :  { %705 = vset.pattern.permute.xlu1 %v875_v16  ;;  %708 = vset.pattern.permute.xlu0 %v876_v17  ;;  %744 = vrcp.f32 %v321_v18 }
 0x2ad   :  { %349 = vperm.xlu2 %701, %v952_v15   ;;  %403 = vperm.xlu1 %705, %v952_v15  }
 0x2ae   :  { %455 = vperm.xlu0 %708, %v338_v12  }
 0x2b2   :  { %v745_v21 = vpop.eup %744 }
 0x2b3   :  { %v324_v22 = vpop.xlane.xlu1 %323  ;;  %v331_v23 = vmul.f32 %v745_v21, %v737_v58  ;;  %v442_v58 = vperm.slane %v917_v7, 3 }
 0x2b4   :  { %746 = vrcp.f32 %v324_v22 }
 0x2b5   :  { %703 = vset.pattern.permute.xlu2 %v873_v63  ;;  %706 = vset.pattern.permute.xlu1 %v877_v19  ;;  %v340_v24 = vsel %vm944_vm6, %v331_v23, -9e+15  ;;  %v554_v23 = vperm.slane %v917_v7, 7 }
 0x2b6   :  { %711 = vset.pattern.permute.xlu0 %v878_v20  ;;  %375 = vperm.xlu2 %703, %v952_v15  }
 0x2b7   :  { %427 = vperm.xlu1 %706, %v338_v12   ;;  %487 = vperm.xlu0 %711, %v952_v15  }
 0x2ba   :  { %v747_v25 = vpop.eup %746 }
 0x2bb   :  { %v332_v26 = vmul.f32 %v747_v25, %v739_v61 }
 0x2bd   :  { %v341_v28 = vsel %vm944_vm6, %v332_v26, -9e+15 }
 0x2be   :  { %704 = vset.pattern.permute.xlu2 %v875_v16 }
 0x2bf   :  { %709 = vset.pattern.permute.xlu1 %v876_v17  ;;  %717 = vset.pattern.permute.xlu0 %v873_v63 }
 0x2c0   :  { %399 = vperm.xlu2 %704, %v338_v12   ;;  %459 = vperm.xlu1 %709, %v952_v15  }
 0x2c1   :  { %379 = vperm.xlu0 %717, %v340_v24  }
 0x2c8   :  { %707 = vset.pattern.permute.xlu2 %v877_v19  ;;  %712 = vset.pattern.permute.xlu1 %v879_v27 }
 0x2c9   :  { %431 = vperm.xlu2 %707, %v952_v15   ;;  %720 = vset.pattern.permute.xlu0 %v875_v16 }
 0x2ca   :  { %511 = vperm.xlu1 %712, %v338_v12   ;;  %411 = vperm.xlu0 %720, %v341_v28  }
 0x2d1   :  { %710 = vset.pattern.permute.xlu2 %v878_v20 }
 0x2d2   :  { %715 = vset.pattern.permute.xlu1 %v874_v0  ;;  %483 = vperm.xlu2 %710, %v338_v12  }
 0x2d3   :  { %727 = vset.pattern.permute.xlu0 %v879_v27  ;;  %354 = vperm.xlu1 %715, %v340_v24  }
 0x2d4   :  { %519 = vperm.xlu0 %727, %v340_v24  }
 0x2da   :  { %713 = vset.pattern.permute.xlu2 %v879_v27 }
 0x2db   :  { %515 = vperm.xlu2 %713, %v952_v15   ;;  %718 = vset.pattern.permute.xlu1 %v873_v63 }
 0x2dc   :  { %731 = vset.pattern.permute.xlu0 %v880_v29  ;;  %383 = vperm.xlu1 %718, %v341_v28  }
 0x2dd   :  { %551 = vperm.xlu0 %731, %v341_v28  }
 0x2e3   :  { %714 = vset.pattern.permute.xlu2 %v880_v29 }
 0x2e4   :  { %539 = vperm.xlu2 %714, %v338_v12   ;;  %721 = vset.pattern.permute.xlu1 %v877_v19 }
 0x2e5   :  { %435 = vperm.xlu1 %721, %v340_v24  }
 0x2ec   :  { %716 = vset.pattern.permute.xlu2 %v874_v0  ;;  %v499_v0 = vperm.slane %v923_v9, 5 }
 0x2ed   :  { %359 = vperm.xlu2 %716, %v341_v28   ;;  %724 = vset.pattern.permute.xlu1 %v876_v17 }
 0x2ee   :  { %467 = vperm.xlu1 %724, %v341_v28  }
 0x2f5   :  { %719 = vset.pattern.permute.xlu2 %v875_v16  ;;  %v498_v16 = vperm.slane %v917_v7, 5 }
 0x2f6   :  { %407 = vperm.xlu2 %719, %v340_v24   ;;  %725 = vset.pattern.permute.xlu1 %v878_v20 }
 0x2f7   :  { %491 = vperm.xlu1 %725, %v340_v24  }
 0x2fe   :  { %722 = vset.pattern.permute.xlu2 %v877_v19  ;;  %v526_v19 = vperm.slane %v917_v7, 6 }
 0x2ff   :  { %439 = vperm.xlu2 %722, %v341_v28   ;;  %728 = vset.pattern.permute.xlu1 %v879_v27 }
 0x300   :  { %523 = vperm.xlu1 %728, %v341_v28  }
 0x307   :  { %723 = vset.pattern.permute.xlu2 %v876_v17  ;;  %v350_v31 = vpop.permute.xlu2 %349 }
 0x308   :  { %463 = vperm.xlu2 %723, %v340_v24   ;;  %729 = vset.pattern.permute.xlu1 %v880_v29  ;;  %v367_v32 = vmul.f32 %v363_v30, %v350_v31 }
 0x309   :  { %543 = vperm.xlu1 %729, %v952_v15  }
 0x310   :  { %726 = vset.pattern.permute.xlu2 %v878_v20  ;;  %v376_v34 = vpop.permute.xlu2 %375 }
 0x311   :  { %495 = vperm.xlu2 %726, %v341_v28   ;;  %v391_v35 = vmul.f32 %v387_v33, %v376_v34 }
 0x313   :  { %v395_v36 = vadd.f32 %v391_v35, %v367_v32 }
 0x316   :  { %v372_v37 = vpop.permute.xlu1 %371  ;;  %v345_v39 = vpop.permute.xlu0 %344 }
 0x317   :  { %v390_v52 = vmul.f32 %v386_v49, %v372_v37  ;;  %v366_v53 = vmul.f32 %v362_v50, %v345_v39  ;;  %v364_v50 = vperm.slane %v921_v8, 0 }
 0x319   :  { %730 = vset.pattern.permute.xlu2 %v880_v29  ;;  %v394_v56 = vadd.f32 %v390_v52, %v366_v53  ;;  %v388_v52 = vperm.slane %v921_v8, 1 }
 0x31a   :  { %547 = vperm.xlu2 %730, %v340_v24   ;;  %v400_v38 = vpop.permute.xlu2 %399 }
 0x31b   :  { %v418_v57 = vmul.f32 %v414_v55, %v400_v38 }
 0x31d   :  { %v422_v63 = vadd.f32 %v418_v57, %v394_v56  ;;  %v416_v56 = vperm.slane %v921_v8, 2 }
 0x31f   :  { %v404_v41 = vpop.permute.xlu1 %403 }
 0x320   :  { %v419_v42 = vmul.f32 %v415_v40, %v404_v41  ;;  %v456_v48 = vpop.permute.xlu0 %455 }
 0x321   :  { %v474_v13 = vmul.f32 %v470_v3, %v456_v48  ;;  %v445_v3 = vperm.slane %v926_v10, 3 }
 0x322   :  { %v423_v43 = vadd.f32 %v419_v42, %v395_v36 }
 0x323   :  { %v432_v45 = vpop.permute.xlu2 %431 }
 0x324   :  { %v447_v46 = vmul.f32 %v443_v44, %v432_v45 }
 0x326   :  { %v451_v47 = vadd.f32 %v447_v46, %v423_v43 }
 0x329   :  { %v428_v51 = vpop.permute.xlu1 %427  ;;  %v488_v61 = vpop.permute.xlu0 %487 }
 0x32a   :  { %v446_v59 = vmul.f32 %v442_v58, %v428_v51  ;;  %v503_v5 = vmul.f32 %v499_v0, %v488_v61  ;;  %v389_v51 = vperm.slane %v926_v10, 1  ;;  %v417_v61 = vperm.slane %v926_v10, 2 }
 0x32c   :  { %v484_v54 = vpop.permute.xlu2 %483  ;;  %v450_v4 = vadd.f32 %v446_v59, %v422_v63  ;;  %v472_v63 = vperm.slane %v921_v8, 4 }
 0x32d   :  { %v502_v18 = vmul.f32 %v498_v16, %v484_v54  ;;  %v365_v54 = vperm.slane %v926_v10, 0  ;;  %v501_v16 = vperm.slane %v926_v10, 5 }
 0x32e   :  { %v478_v15 = vadd.f32 %v474_v13, %v450_v4 }
 0x330   :  { %v506_v21 = vadd.f32 %v502_v18, %v478_v15 }
 0x332   :  { %v460_v62 = vpop.permute.xlu1 %459 }
 0x333   :  { %v475_v1 = vmul.f32 %v471_v60, %v460_v62  ;;  %v380_v36 = vpop.permute.xlu0 %379  ;;  %v444_v60 = vperm.slane %v921_v8, 3 }
 0x334   :  { %v392_v57 = vmul.f32 %v388_v52, %v380_v36 }
 0x335   :  { %v479_v6 = vadd.f32 %v475_v1, %v451_v47  ;;  %v516_v11 = vpop.permute.xlu2 %515 }
 0x336   :  { %v531_v12 = vmul.f32 %v527_v2, %v516_v11 }
 0x337   :  { %v507_v14 = vadd.f32 %v503_v5, %v479_v6  ;;  %v473_v5 = vperm.slane %v926_v10, 4  ;;  %v500_v6 = vperm.slane %v921_v8, 5 }
 0x339   :  { %v988_v17 = vadd.f32 %v531_v12, %v507_v14 }
 0x33c   :  { %v512_v20 = vpop.permute.xlu1 %511  ;;  %v412_v46 = vpop.permute.xlu0 %411 }
 0x33d   :  { %v530_v22 = vmul.f32 %v526_v19, %v512_v20  ;;  %v421_v11 = vmul.f32 %v417_v61, %v412_v46 }
 0x33e   :  { %v540_v24 = vpop.permute.xlu2 %539 }
 0x33f   :  { %v534_v25 = vadd.f32 %v530_v22, %v506_v21  ;;  %v558_v26 = vmul.f32 %v554_v23, %v540_v24 }
 0x341   :  { %v562_v27 = vadd.f32 %v558_v26, %v534_v25  ;;  %v528_v25 = vperm.slane %v921_v8, 6 }
 0x343   :  { %v670_v28 = vmul.f32 -1.442695, %v562_v27 }
 0x345   :  { %748 = vpow2.f32 %v670_v28  ;;  %v355_v29 = vpop.permute.xlu1 %354  ;;  %v529_v28 = vperm.slane %v926_v10, 6 }
 0x346   :  { %v368_v53 = vmul.f32 %v364_v50, %v355_v29  ;;  %v520_v62 = vpop.permute.xlu0 %519 }
 0x347   :  { %v360_v30 = vpop.permute.xlu2 %359 }
 0x348   :  { %v369_v58 = vmul.f32 %v365_v54, %v360_v30  ;;  %v396_v0 = vadd.f32 %v392_v57, %v368_v53 }
 0x34b   :  { %v749_v31 = vpop.eup %748 }
 0x34c   :  { %v578_v32 = vadd.f32 1.0, %v749_v31  ;;  %v556_v31 = vperm.slane %v921_v8, 7 }
 0x34e   :  { %750 = vrcp.f32 %v578_v32  ;;  %v384_v33 = vpop.permute.xlu1 %383  ;;  %v593_v40 = vand.u32 2147483648, %v578_v32  ;;  %v591_v42 = vand.u32 2147483647, %v578_v32  ;;  %vm587_vm8 = vweird.f32 %v578_v32 }
 0x34f   :  { %v393_v55 = vmul.f32 %v389_v51, %v384_v33  ;;  %v552_v29 = vpop.permute.xlu0 %551  ;;  %v557_v33 = vperm.slane %v926_v10, 7 }
 0x350   :  { %v408_v34 = vpop.permute.xlu2 %407  ;;  %v594_v44 = vor.u32 1.1754944e-38, %v593_v40  ;;  %vm592_vm10 = vcmp.eq.f32.partialorder %v591_v42, 8.507059e+37 }
 0x351   :  { %v420_v59 = vmul.f32 %v416_v56, %v408_v34  ;;  %v397_v1 = vadd.f32 %v393_v55, %v369_v58 }
 0x353   :  { %v424_v12 = vadd.f32 %v420_v59, %v396_v0  ;;  %v425_v19 = vadd.f32 %v421_v11, %v397_v1 }
 0x354   :  { %v751_v35 = vpop.eup %750 }
 0x355   :  { %v583_v37 = vmul.f32 %v751_v35, %v578_v32  ;;  %vm588_vm7 = vweird.f32 %v751_v35  ;;  %v532_v32 = vmul.f32 %v528_v25, %v520_v62 }
 0x356   :  { %vm589_vm9 = vmor %vm587_vm8, %vm588_vm7 }
 0x357   :  { %v584_v38 = vsub.f32 1.0, %v583_v37  ;;  %v436_v39 = vpop.permute.xlu1 %435  ;;  %v561_v37 = vmul.f32 %v557_v33, %v552_v29 }
 0x358   :  { %v448_v2 = vmul.f32 %v444_v60, %v436_v39 }
 0x359   :  { %v585_v7 = vmul.f32 %v751_v35, %v584_v38  ;;  %v440_v41 = vpop.permute.xlu2 %439 }
 0x35a   :  { %v449_v13 = vmul.f32 %v445_v3, %v440_v41  ;;  %v452_v18 = vadd.f32 %v448_v2, %v424_v12 }
 0x35b   :  { %v586_v43 = vadd.f32 %v751_v35, %v585_v7 }
 0x35c   :  { %v453_v22 = vadd.f32 %v449_v13, %v425_v19 }
 0x35d   :  { %v590_v45 = vsel %vm589_vm9, %v751_v35, %v586_v43 }
 0x35e   :  { %v595_v47 = vsel %vm592_vm10, %v594_v44, %v590_v45  ;;  %v555_v44 = vperm.slane %v923_v9, 7 }
 0x35f   :  { %642 = vst [vmem:[#allocation8] sm:$0xff] %v595_v47 }
 0x360   :  { %v468_v48 = vpop.permute.xlu1 %467 }
 0x361   :  { %v477_v20 = vmul.f32 %v473_v5, %v468_v48 }
 0x362   :  { %v464_v49 = vpop.permute.xlu2 %463 }
 0x363   :  { %v476_v14 = vmul.f32 %v472_v63, %v464_v49  ;;  %v481_v26 = vadd.f32 %v477_v20, %v453_v22 }
 0x365   :  { %v480_v23 = vadd.f32 %v476_v14, %v452_v18 }
 0x369   :  { %v492_v4 = vpop.permute.xlu1 %491 }
 0x36a   :  { %v504_v21 = vmul.f32 %v500_v6, %v492_v4 }
 0x36b   :  { %v496_v15 = vpop.permute.xlu2 %495 }
 0x36c   :  { %v505_v24 = vmul.f32 %v501_v16, %v496_v15  ;;  %v508_v27 = vadd.f32 %v504_v21, %v480_v23 }
 0x36e   :  { %v509_v34 = vadd.f32 %v505_v24, %v481_v26  ;;  %v536_v39 = vadd.f32 %v532_v32, %v508_v27 }
 0x372   :  { %v524_v30 = vpop.permute.xlu1 %523 }
 0x373   :  { %v533_v35 = vmul.f32 %v529_v28, %v524_v30 }
 0x374   :  { %v548_v36 = vpop.permute.xlu2 %547 }
 0x375   :  { %v537_v38 = vadd.f32 %v533_v35, %v509_v34  ;;  %v560_v40 = vmul.f32 %v556_v31, %v548_v36 }
 0x377   :  { %v565_v7 = vadd.f32 %v561_v37, %v537_v38  ;;  %v564_v41 = vadd.f32 %v560_v40, %v536_v39 }
 0x379   :  { %v673_v42 = vmul.f32 -1.442695, %v565_v7  ;;  %v672_v43 = vmul.f32 -1.442695, %v564_v41 }
 0x37b   :  { %752 = vpow2.f32 %v673_v42  ;;  %v544_v45 = vpop.permute.xlu1 %543 }
 0x37c   :  { %754 = vpow2.f32 %v672_v43  ;;  %v559_v8 = vmul.f32 %v555_v44, %v544_v45 }
 0x37e   :  { %v563_v46 = vadd.f32 %v559_v8, %v988_v17 }
 0x380   :  { %v671_v10 = vmul.f32 -1.442695, %v563_v46 }
 0x381   :  { %v753_v47 = vpop.eup %752 }
 0x382   :  { %v755_v48 = vpop.eup %754  ;;  %v581_v49 = vadd.f32 1.0, %v753_v47  ;;  %756 = vpow2.f32 %v671_v10 }
 0x383   :  { %v580_v50 = vadd.f32 1.0, %v755_v48 }
 0x384   :  { %758 = vrcp.f32 %v581_v49  ;;  %v638_v58 = vand.u32 2147483648, %v581_v49  ;;  %v636_v60 = vand.u32 2147483647, %v581_v49  ;;  %vm632_vm13 = vweird.f32 %v581_v49 }
 0x385   :  { %760 = vrcp.f32 %v580_v50  ;;  %v623_v59 = vand.u32 2147483648, %v580_v50  ;;  %v621_v62 = vand.u32 2147483647, %v580_v50  ;;  %vm617_vm14 = vweird.f32 %v580_v50 }
 0x386   :  { %v639_v3 = vor.u32 1.1754944e-38, %v638_v58  ;;  %vm637_vm1 = vcmp.eq.f32.partialorder %v636_v60, 8.507059e+37 }
 0x387   :  { %v624_v4 = vor.u32 1.1754944e-38, %v623_v59  ;;  %vm622_vm2 = vcmp.eq.f32.partialorder %v621_v62, 8.507059e+37 }
 0x388   :  { %v757_v51 = vpop.eup %756 }
 0x389   :  { %v579_v52 = vadd.f32 1.0, %v757_v51 }
 0x38a   :  { %v759_v53 = vpop.eup %758 }
 0x38b   :  { %v761_v54 = vpop.eup %760  ;;  %v628_v55 = vmul.f32 %v759_v53, %v581_v49  ;;  %762 = vrcp.f32 %v579_v52  ;;  %vm633_vm11 = vweird.f32 %v759_v53  ;;  %v608_v13 = vand.u32 2147483648, %v579_v52 }
 0x38c   :  { %v613_v9 = vmul.f32 %v761_v54, %v580_v50  ;;  %vm618_vm12 = vweird.f32 %v761_v54  ;;  %vm634_vm15 = vmor %vm632_vm13, %vm633_vm11  ;;  %v606_v16 = vand.u32 2147483647, %v579_v52  ;;  %vm602_vm4 = vweird.f32 %v579_v52 }
 0x38d   :  { %v629_v56 = vsub.f32 1.0, %v628_v55  ;;  %vm619_vm0 = vmor %vm617_vm14, %vm618_vm12  ;;  %v609_v19 = vor.u32 1.1754944e-38, %v608_v13 }
 0x38e   :  { %v614_v57 = vsub.f32 1.0, %v613_v9  ;;  %vm607_vm6 = vcmp.eq.f32.partialorder %v606_v16, 8.507059e+37 }
 0x38f   :  { %v630_v17 = vmul.f32 %v759_v53, %v629_v56 }
 0x390   :  { %v615_v61 = vmul.f32 %v761_v54, %v614_v57 }
 0x391   :  { %v763_v63 = vpop.eup %762  ;;  %v631_v0 = vadd.f32 %v759_v53, %v630_v17 }
 0x392   :  { %v598_v1 = vmul.f32 %v763_v63, %v579_v52  ;;  %v616_v2 = vadd.f32 %v761_v54, %v615_v61  ;;  %vm603_vm3 = vweird.f32 %v763_v63 }
 0x393   :  { %v635_v5 = vsel %vm634_vm15, %v759_v53, %v631_v0  ;;  %vm604_vm5 = vmor %vm602_vm4, %vm603_vm3 }
 0x394   :  { %v599_v6 = vsub.f32 1.0, %v598_v1  ;;  %v620_v11 = vsel %vm619_vm0, %v761_v54, %v616_v2  ;;  %v640_v12 = vsel %vm637_vm1, %v639_v3, %v635_v5 }
 0x395   :  { %v625_v14 = vsel %vm622_vm2, %v624_v4, %v620_v11  ;;  %645 = vst [vmem:[#allocation8 + $0x18] sm:$0xff] %v640_v12 }
 0x396   :  { %v600_v15 = vmul.f32 %v763_v63, %v599_v6  ;;  %644 = vst [vmem:[#allocation8 + $0x10] sm:$0xff] %v625_v14 }
 0x398   :  { %v601_v18 = vadd.f32 %v763_v63, %v600_v15 }
 0x39a   :  { %v605_v20 = vsel %vm604_vm5, %v763_v63, %v601_v18 }
 0x39b   :  { %v610_v21 = vsel %vm607_vm6, %v609_v19, %v605_v20 }
 0x39c   :  { %643 = vst [vmem:[#allocation8 + $0x8] sm:$0xff] %v610_v21 }
 0x39d   :  { %658 = dma.vmem_to_hbm [thread:$0]  %s651_s28, 512, %s653_s4, [#allocation4], %s867_s20, %s867_s20, %s868_s21  }
 0x39e   :  { %864 = dma.done.wait [#allocation4], 512  }
 0x39f   :  { %865 = vsyncadd [#allocation4], 4294966784 }
 0x3a0   :  { %663 = vsyncpa [#allocation3], 1 }
 0x3a1   :  { %664 = vsyncpa [#allocation6], 1 }
 0x3a2   :  { %665 = vsyncpa [#allocation4], 1 }

</bundles_post_ra>
